<compile_context>
chip_gen: v7x
topology: tpu7x:2x2x1
jax: 0.10.0
libtpu: 0.0.40
codegen_flags: <defaults>
</compile_context>

<pallas_src>
import functools

import jax
import jax.numpy as jnp
from jax.experimental import pallas as pl
from jax.experimental.pallas import tpu as pltpu


def head_c_kernel(xq_ref, xk_ref, wq_ref, wk_ref, wv_ref, o_ref,
                  q_scr, m_scr, l_scr, acc_scr,
                  *, softmax_dtype, exact_final_div):
    Bb, Tq, C = xq_ref.shape
    _, Tk, _ = xk_ref.shape
    H = wv_ref.shape[1]

    qi = pl.program_id(1)
    ki = pl.program_id(2)
    nk = pl.num_programs(2)
    q_start = qi * Tq
    k_start = ki * Tk

    # New q tile: project q once (softmax scale already folded into wq
    # host-side) and reset the online-softmax state.
    @pl.when(ki == 0)
    def _init():
        q = jnp.dot(xq_ref[...].reshape(Bb * Tq, C), wq_ref[...],
                    preferred_element_type=jnp.float32)
        q_scr[...] = q.reshape(Bb, Tq, H).astype(q_scr.dtype)
        m_scr[...] = jnp.full(m_scr.shape, -jnp.inf, m_scr.dtype)
        l_scr[...] = jnp.zeros(l_scr.shape, l_scr.dtype)
        acc_scr[...] = jnp.zeros(acc_scr.shape, acc_scr.dtype)

    def _attend(apply_causal_mask):
        mxu_dtype = xk_ref.dtype
        xk2d = xk_ref[...].reshape(Bb * Tk, C)
        k = jnp.dot(xk2d, wk_ref[...], preferred_element_type=jnp.float32)
        v = jnp.dot(xk2d, wv_ref[...], preferred_element_type=jnp.float32)
        k = k.reshape(Bb, Tk, H).astype(mxu_dtype)
        v = v.reshape(Bb, Tk, H).astype(mxu_dtype)

        # Scores: contract q/k along the head dim (no explicit k^T temporary).
        s = jnp.einsum('bqh,bkh->bqk', q_scr[...], k,
                       preferred_element_type=jnp.float32)      # (Bb,Tq,Tk) f32

        if apply_causal_mask:
            # Only diagonal tiles pay for the mask (small per-tile iotas).
            rows = q_start + jax.lax.broadcasted_iota(jnp.int32, (Tq, Tk), 0)
            cols = k_start + jax.lax.broadcasted_iota(jnp.int32, (Tq, Tk), 1)
            s = jnp.where((rows >= cols)[None, :, :], s, -jnp.inf)

        m_prev = m_scr[...]                                     # (Bb,Tq,1) f32
        m_new = jnp.maximum(m_prev, jnp.max(s, axis=-1, keepdims=True))
        alpha = jnp.exp(m_prev - m_new)                         # (Bb,Tq,1) f32
        # exp / probabilities in softmax_dtype (bf16 on v6e/v7x, f32 on v5e /
        # parity path); row sums and the accumulator stay in f32.
        p = jnp.exp((s - m_new).astype(softmax_dtype))          # (Bb,Tq,Tk)
        l_scr[...] = alpha * l_scr[...] + jnp.sum(
            p.astype(jnp.float32), axis=-1, keepdims=True)
        acc_scr[...] = alpha * acc_scr[...] + jnp.einsum(
            'bqk,bkh->bqh', p.astype(mxu_dtype), v,
            preferred_element_type=jnp.float32)
        m_scr[...] = m_new

    # Interior tiles (entirely below the causal diagonal): no mask work at all.
    is_interior = (k_start + Tk - 1) <= q_start
    # Diagonal tiles: straddle the causal boundary, need the per-tile mask.
    is_diagonal = jnp.logical_and((k_start + Tk - 1) > q_start,
                                  k_start < (q_start + Tq))
    # Tiles entirely above the diagonal: neither branch runs (skipped).

    @pl.when(is_interior)
    def _interior():
        _attend(apply_causal_mask=False)

    @pl.when(is_diagonal)
    def _diagonal():
        _attend(apply_causal_mask=True)

    # TODO(synk): nn.Dropout(0.2) on the attention weights is identity in eval
    # mode; training-mode stochastic dropout (torch RNG) is not reproduced.

    @pl.when(ki == nk - 1)
    def _finalize():
        acc = acc_scr[...]
        l = l_scr[...]
        if exact_final_div:
            out = acc / l                                   # exact, f32 parity
        else:
            out = acc * pl.reciprocal(l, approx=True)       # EUP slot
        o_ref[...] = out.astype(o_ref.dtype)


# ----------------------------------------------------------------------------
# Host-side helpers
# ----------------------------------------------------------------------------

def _block_diag_from_grouped(w, C):
    # w: (H, Cg) per-group conv weights (Conv1d weight (H, Cg, 1) squeezed).
    # Returns (C, H) such that (x @ W)[t, h] == sum_c x[t, h*Cg + c] * w[h, c].
    H, Cg = w.shape
    eye = jnp.eye(H, dtype=w.dtype)                  # (H, H)
    wb = eye[:, None, :] * w[:, :, None]             # (H, Cg, H)
    return wb.reshape(C, H)


def _round_up(n, m):
    return ((n + m - 1) // m) * m


def _vmem_estimate_bytes(bb, tq, tk, C, H, cd_isize, sm_isize, out_isize):
    """Account for ALL per-step VMEM: pipelined blocks, scratch, temporaries."""
    lane, sub = 128, 8
    Hp = _round_up(H, lane)
    Cp = _round_up(C, lane)
    tq_p = _round_up(tq, sub)
    tk_p = _round_up(tk, sub)
    tk_lane = _round_up(tk, lane)
    blocks = (2 * bb * tq_p * Cp * cd_isize            # xq (double-buffered)
              + 2 * bb * tk_p * Cp * cd_isize          # xk (double-buffered)
              + 3 * 2 * _round_up(C, sub) * Hp * cd_isize   # Wq, Wk, Wv
              + 2 * bb * tq_p * Hp * out_isize)        # output block
    scratch = (bb * tq_p * Hp * cd_isize               # q scratch
               + 2 * bb * tq_p * lane * 4              # m, l (lane-padded f32)
               + bb * tq_p * Hp * 4)                   # accumulator (f32)
    temps = (bb * tq_p * tk_lane * 4                   # scores (f32)
             + bb * tq_p * tk_lane * sm_isize          # probabilities
             + 3 * tq_p * tk_lane * 4)                 # diagonal-tile iota/mask
    return blocks + scratch + temps


def _vmem_budget_bytes():
    # Generation-aware budget: v5e/v6e have 128 MiB physical VMEM per core;
    # v7x only 64 MiB, so be conservative there (and for unknown chips).
    try:
        kind = jax.devices()[0].device_kind.lower()
    except Exception:
        kind = ""
    if "v5" in kind or "v6" in kind:
        return 96 * 1024 * 1024
    return 40 * 1024 * 1024


def _default_softmax_dtype(compute_dtype):
    if jnp.dtype(compute_dtype) == jnp.dtype(jnp.float32):
        return jnp.float32
    try:
        kind = jax.devices()[0].device_kind.lower()
    except Exception:
        kind = ""
    if "v5" in kind:           # v5e has no bf16 VPU/EUP: keep elementwise f32
        return jnp.float32
    return compute_dtype


def _pick_seq_tile(T, target=256):
    if T <= target:
        return T
    for t in (target, 512, 128, 64, 32, 16, 8):
        if T % t == 0:
            return t
    return T


def _pick_block_b(B, n_q_tiles, fits):
    best = 1
    for bb in range(1, B + 1):
        if B % bb:
            continue
        if not fits(bb):
            continue
        # Keep >= 2 parallel grid steps (batch x q-tiles) so both v7x
        # TensorCores get work, unless the problem only has a single step.
        if (B // bb) * n_q_tiles >= 2 or B * n_q_tiles < 2:
            best = bb
    return best


def head_c_forward(x, w_key, w_query, w_value, *,
                   compute_dtype=jnp.bfloat16, softmax_dtype=None,
                   block_b=None, tile_q=None, tile_k=None):
    """x: (B, T, C); w_*: (head_size, C // head_size) grouped conv weights."""
    B, T, C = x.shape
    H, Cg = w_key.shape
    assert H * Cg == C

    # Fold the softmax scale (C ** -0.5) into the query weights; build the
    # block-diagonal (C, H) equivalents of the grouped 1x1 convolutions.
    scale = float(C) ** (-0.5)
    Wq = _block_diag_from_grouped(w_query.astype(jnp.float32) * scale, C)
    Wk = _block_diag_from_grouped(w_key.astype(jnp.float32), C)
    Wv = _block_diag_from_grouped(w_value.astype(jnp.float32), C)
    Wq = Wq.astype(compute_dtype)
    Wk = Wk.astype(compute_dtype)
    Wv = Wv.astype(compute_dtype)

    if softmax_dtype is None:
        softmax_dtype = _default_softmax_dtype(compute_dtype)
    exact_final_div = jnp.dtype(compute_dtype) == jnp.dtype(jnp.float32)

    if tile_q is None:
        tile_q = _pick_seq_tile(T)
    if tile_k is None:
        tile_k = tile_q
    assert T % tile_q == 0 and (tile_q % 8 == 0 or tile_q == T)
    assert T % tile_k == 0 and (tile_k % 8 == 0 or tile_k == T)
    n_q = T // tile_q
    n_k = T // tile_k

    budget = _vmem_budget_bytes()
    cd_isize = jnp.dtype(compute_dtype).itemsize
    sm_isize = jnp.dtype(softmax_dtype).itemsize
    out_isize = jnp.dtype(x.dtype).itemsize

    def fits(bb):
        est = _vmem_estimate_bytes(bb, tile_q, tile_k, C, H,
                                   cd_isize, sm_isize, out_isize)
        return est <= 0.8 * budget

    if block_b is None:
        block_b = _pick_block_b(B, n_q, fits)
    assert B % block_b == 0

    est = _vmem_estimate_bytes(block_b, tile_q, tile_k, C, H,
                               cd_isize, sm_isize, out_isize)
    vmem_limit = int(min(budget, max(32 * 1024 * 1024, 1.25 * est)))

    x_in = x.astype(compute_dtype)   # halves HBM traffic for x when bf16

    kernel = functools.partial(head_c_kernel,
                               softmax_dtype=softmax_dtype,
                               exact_final_div=exact_final_div)

    return pl.pallas_call(
        kernel,
        out_shape=jax.ShapeDtypeStruct((B, T, H), x.dtype),
        grid_spec=pltpu.PrefetchScalarGridSpec(
            num_scalar_prefetch=0,
            grid=(B // block_b, n_q, n_k),
            in_specs=[
                pl.BlockSpec((block_b, tile_q, C), lambda b, q, k: (b, q, 0)),
                pl.BlockSpec((block_b, tile_k, C), lambda b, q, k: (b, k, 0)),
                pl.BlockSpec((C, H), lambda b, q, k: (0, 0)),
                pl.BlockSpec((C, H), lambda b, q, k: (0, 0)),
                pl.BlockSpec((C, H), lambda b, q, k: (0, 0)),
            ],
            out_specs=pl.BlockSpec((block_b, tile_q, H),
                                   lambda b, q, k: (b, q, 0)),
            scratch_shapes=[
                pltpu.VMEM((block_b, tile_q, H), compute_dtype),   # q
                pltpu.VMEM((block_b, tile_q, 1), jnp.float32),     # running max
                pltpu.VMEM((block_b, tile_q, 1), jnp.float32),     # running sum
                pltpu.VMEM((block_b, tile_q, H), jnp.float32),     # accumulator
            ]),
        compiler_params=pltpu.CompilerParams(
            dimension_semantics=("parallel", "parallel", "arbitrary"),
            vmem_limit_bytes=vmem_limit),
    )(x_in, x_in, Wq, Wk, Wv)


def head_c_reference(x, w_key, w_query, w_value):
    # Pure-JAX f32 reference mirroring the PyTorch forward (dropout eval mode).
    B, T, C = x.shape
    H, Cg = w_key.shape
    xg = x.reshape(B, T, H, Cg)
    k = jnp.einsum("bthc,hc->bth", xg, w_key)
    q = jnp.einsum("bthc,hc->bth", xg, w_query)
    v = jnp.einsum("bthc,hc->bth", xg, w_value)
    wei = jnp.einsum("bqh,bkh->bqk", q, k) * (C ** -0.5)
    tril = jnp.tril(jnp.ones((T, T), dtype=bool))
    wei = jnp.where(tril, wei, -jnp.inf)
    wei = jax.nn.softmax(wei, axis=-1)
    return jnp.einsum("bqk,bkh->bqh", wei, v)


if __name__ == "__main__":
    # Small shapes consistent with the module (C plays the role of n_embed,
    # head_size divides C; Conv1d weight (H, C // H, 1) squeezed to (H, C//H)).
    key = jax.random.PRNGKey(0)

    # --- Case 1: single-tile path. ---
    B, T, C, head_size = 2, 16, 64, 8
    Cg = C // head_size
    kx, kk, kq, kv, kx2 = jax.random.split(key, 5)
    x = jax.random.normal(kx, (B, T, C), dtype=jnp.float32)
    w_key = jax.random.normal(kk, (head_size, Cg), dtype=jnp.float32) * 0.1
    w_query = jax.random.normal(kq, (head_size, Cg), dtype=jnp.float32) * 0.1
    w_value = jax.random.normal(kv, (head_size, Cg), dtype=jnp.float32) * 0.1

    ref = head_c_reference(x, w_key, w_query, w_value)

    out = jax.block_until_ready(head_c_forward(x, w_key, w_query, w_value))
    assert out.shape == (B, T, head_size)
    assert out.dtype == x.dtype
    assert jnp.allclose(out, ref, atol=2e-2, rtol=2e-2), "bf16 path mismatch"

    out32 = jax.block_until_ready(
        head_c_forward(x, w_key, w_query, w_value, compute_dtype=jnp.float32))
    assert jnp.allclose(out32, ref, atol=5e-3, rtol=5e-3), "f32 path mismatch"

    # --- Case 2: multi-tile flash path (interior / diagonal / skipped tiles). ---
    B2, T2 = 2, 32
    x2 = jax.random.normal(kx2, (B2, T2, C), dtype=jnp.float32)
    ref2 = head_c_reference(x2, w_key, w_query, w_value)

    out2_32 = jax.block_until_ready(
        head_c_forward(x2, w_key, w_query, w_value, compute_dtype=jnp.float32,
                       tile_q=8, tile_k=8))
    assert jnp.allclose(out2_32, ref2, atol=1e-4, rtol=1e-4), "tiled f32 mismatch"

    out2_bf = jax.block_until_ready(
        head_c_forward(x2, w_key, w_query, w_value, tile_q=8, tile_k=8))
    assert jnp.allclose(out2_bf, ref2, atol=3e-2, rtol=3e-2), "tiled bf16 mismatch"

    print("KERNEL_OK")
</pallas_src>

<mosaic_0001>
module attributes {stable_mosaic.version = 11 : i64} {
  func.func @head_c_kernel(%arg0: i32, %arg1: i32, %arg2: i32, %arg3: memref<1x16x64xbf16, #tpu.memory_space<vmem>>, %arg4: memref<1x16x64xbf16, #tpu.memory_space<vmem>>, %arg5: memref<64x8xbf16, #tpu.memory_space<vmem>>, %arg6: memref<64x8xbf16, #tpu.memory_space<vmem>>, %arg7: memref<64x8xbf16, #tpu.memory_space<vmem>>, %arg8: memref<1x16x8xf32, #tpu.memory_space<vmem>>, %arg9: memref<1x16x8xbf16, #tpu.memory_space<vmem>>, %arg10: memref<1x16x1xf32, #tpu.memory_space<vmem>>, %arg11: memref<1x16x1xf32, #tpu.memory_space<vmem>>, %arg12: memref<1x16x8xf32, #tpu.memory_space<vmem>>) attributes {dimension_semantics = [#tpu.dimension_semantics<parallel>, #tpu.dimension_semantics<parallel>, #tpu.dimension_semantics<arbitrary>], iteration_bounds = array<i64: 2, 1, 1>, scalar_prefetch = 0 : i64, scratch_operands = 4 : i64, tpu.core_type = #tpu.core_type<tc>, window_params = [{transform_indices = @transform_0, window_bounds = array<i64: 1, 16, 64>}, {transform_indices = @transform_1, window_bounds = array<i64: 1, 16, 64>}, {pipeline_mode = #tpu.pipeline_mode<synchronous>, transform_indices = @transform_2, window_bounds = array<i64: 64, 8>}, {pipeline_mode = #tpu.pipeline_mode<synchronous>, transform_indices = @transform_3, window_bounds = array<i64: 64, 8>}, {pipeline_mode = #tpu.pipeline_mode<synchronous>, transform_indices = @transform_4, window_bounds = array<i64: 64, 8>}, {transform_indices = @transform_5, window_bounds = array<i64: 1, 16, 8>}]} {
    %c16_i32 = arith.constant 16 : i32
    %0 = arith.muli %arg1, %c16_i32 : i32
    %c16_i32_0 = arith.constant 16 : i32
    %1 = arith.muli %arg2, %c16_i32_0 : i32
    %c0_i32 = arith.constant 0 : i32
    %2 = arith.cmpi eq, %arg2, %c0_i32 : i32
    %3 = arith.extui %2 : i1 to i32
    %c0_i32_1 = arith.constant 0 : i32
    %4 = arith.cmpi ne, %3, %c0_i32_1 : i32
    scf.if %4 {
      %c0 = arith.constant 0 : index
      %c0_10 = arith.constant 0 : index
      %c0_11 = arith.constant 0 : index
      %21 = vector.load %arg3[%c0, %c0_10, %c0_11] : memref<1x16x64xbf16, #tpu.memory_space<vmem>>, vector<1x16x64xbf16>
      %22 = vector.shape_cast %21 : vector<1x16x64xbf16> to vector<16x64xbf16>
      %c0_12 = arith.constant 0 : index
      %c0_13 = arith.constant 0 : index
      %23 = vector.load %arg5[%c0_12, %c0_13] : memref<64x8xbf16, #tpu.memory_space<vmem>>, vector<64x8xbf16>
      %cst = arith.constant dense<0.000000e+00> : vector<16x8xf32>
      %24 = tpu.matmul %22, %23, %cst {dimension_numbers = #tpu.dot_dimension_numbers<[1], [0], [0], [1], [0, 0, 1, 1], [], []>} : vector<16x64xbf16>, vector<64x8xbf16>, vector<16x8xf32> -> vector<16x8xf32>
      %25 = vector.shape_cast %24 : vector<16x8xf32> to vector<1x16x8xf32>
      %26 = arith.truncf %25 : vector<1x16x8xf32> to vector<1x16x8xbf16>
      %c0_14 = arith.constant 0 : index
      %c0_15 = arith.constant 0 : index
      %c0_16 = arith.constant 0 : index
      %27 = vector.load %arg9[%c0_14, %c0_15, %c0_16] : memref<1x16x8xbf16, #tpu.memory_space<vmem>>, vector<1x16x8xbf16>
      tpu.vector_store %arg9[%c0_14, %c0_15, %c0_16], %26 {strides = array<i32>} : memref<1x16x8xbf16, #tpu.memory_space<vmem>>, vector<1x16x8xbf16>,
      %cst_17 = arith.constant 0xFF800000 : f32
      %28 = vector.broadcast %cst_17 : f32 to vector<1x16x1xf32>
      %c0_18 = arith.constant 0 : index
      %c0_19 = arith.constant 0 : index
      %c0_20 = arith.constant 0 : index
      %29 = vector.load %arg10[%c0_18, %c0_19, %c0_20] : memref<1x16x1xf32, #tpu.memory_space<vmem>>, vector<1x16x1xf32>
      tpu.vector_store %arg10[%c0_18, %c0_19, %c0_20], %28 {strides = array<i32>} : memref<1x16x1xf32, #tpu.memory_space<vmem>>, vector<1x16x1xf32>,
      %cst_21 = arith.constant 0.000000e+00 : f32
      %30 = vector.broadcast %cst_21 : f32 to vector<1x16x1xf32>
      %c0_22 = arith.constant 0 : index
      %c0_23 = arith.constant 0 : index
      %c0_24 = arith.constant 0 : index
      %31 = vector.load %arg11[%c0_22, %c0_23, %c0_24] : memref<1x16x1xf32, #tpu.memory_space<vmem>>, vector<1x16x1xf32>
      tpu.vector_store %arg11[%c0_22, %c0_23, %c0_24], %30 {strides = array<i32>} : memref<1x16x1xf32, #tpu.memory_space<vmem>>, vector<1x16x1xf32>,
      %cst_25 = arith.constant 0.000000e+00 : f32
      %32 = vector.broadcast %cst_25 : f32 to vector<1x16x8xf32>
      %c0_26 = arith.constant 0 : index
      %c0_27 = arith.constant 0 : index
      %c0_28 = arith.constant 0 : index
      %33 = vector.load %arg12[%c0_26, %c0_27, %c0_28] : memref<1x16x8xf32, #tpu.memory_space<vmem>>, vector<1x16x8xf32>
      tpu.vector_store %arg12[%c0_26, %c0_27, %c0_28], %32 {strides = array<i32>} : memref<1x16x8xf32, #tpu.memory_space<vmem>>, vector<1x16x8xf32>,
    } else {
    }
    %c16_i32_2 = arith.constant 16 : i32
    %5 = arith.addi %1, %c16_i32_2 : i32
    %c1_i32 = arith.constant 1 : i32
    %6 = arith.subi %5, %c1_i32 : i32
    %7 = arith.cmpi sle, %6, %0 : i32
    %c16_i32_3 = arith.constant 16 : i32
    %8 = arith.addi %1, %c16_i32_3 : i32
    %c1_i32_4 = arith.constant 1 : i32
    %9 = arith.subi %8, %c1_i32_4 : i32
    %10 = arith.cmpi sgt, %9, %0 : i32
    %c16_i32_5 = arith.constant 16 : i32
    %11 = arith.addi %0, %c16_i32_5 : i32
    %12 = arith.cmpi slt, %1, %11 : i32
    %13 = arith.andi %10, %12 : i1
    %14 = arith.extui %7 : i1 to i32
    %c0_i32_6 = arith.constant 0 : i32
    %15 = arith.cmpi ne, %14, %c0_i32_6 : i32
    scf.if %15 {
      %c0 = arith.constant 0 : index
      %c0_10 = arith.constant 0 : index
      %c0_11 = arith.constant 0 : index
      %21 = vector.load %arg4[%c0, %c0_10, %c0_11] : memref<1x16x64xbf16, #tpu.memory_space<vmem>>, vector<1x16x64xbf16>
      %22 = vector.shape_cast %21 : vector<1x16x64xbf16> to vector<16x64xbf16>
      %c0_12 = arith.constant 0 : index
      %c0_13 = arith.constant 0 : index
      %23 = vector.load %arg6[%c0_12, %c0_13] : memref<64x8xbf16, #tpu.memory_space<vmem>>, vector<64x8xbf16>
      %cst = arith.constant dense<0.000000e+00> : vector<16x8xf32>
      %24 = tpu.matmul %22, %23, %cst {dimension_numbers = #tpu.dot_dimension_numbers<[1], [0], [0], [1], [0, 0, 1, 1], [], []>} : vector<16x64xbf16>, vector<64x8xbf16>, vector<16x8xf32> -> vector<16x8xf32>
      %c0_14 = arith.constant 0 : index
      %c0_15 = arith.constant 0 : index
      %25 = vector.load %arg7[%c0_14, %c0_15] : memref<64x8xbf16, #tpu.memory_space<vmem>>, vector<64x8xbf16>
      %cst_16 = arith.constant dense<0.000000e+00> : vector<16x8xf32>
      %26 = tpu.matmul %22, %25, %cst_16 {dimension_numbers = #tpu.dot_dimension_numbers<[1], [0], [0], [1], [0, 0, 1, 1], [], []>} : vector<16x64xbf16>, vector<64x8xbf16>, vector<16x8xf32> -> vector<16x8xf32>
      %27 = vector.shape_cast %24 : vector<16x8xf32> to vector<1x16x8xf32>
      %28 = arith.truncf %27 : vector<1x16x8xf32> to vector<1x16x8xbf16>
      %29 = vector.shape_cast %26 : vector<16x8xf32> to vector<1x16x8xf32>
      %30 = arith.truncf %29 : vector<1x16x8xf32> to vector<1x16x8xbf16>
      %c0_17 = arith.constant 0 : index
      %c0_18 = arith.constant 0 : index
      %c0_19 = arith.constant 0 : index
      %31 = vector.load %arg9[%c0_17, %c0_18, %c0_19] : memref<1x16x8xbf16, #tpu.memory_space<vmem>>, vector<1x16x8xbf16>
      "tpu.trace_start"() <{level = 10 : i32, message = "bqh,bkh->bqk"}> : () -> ()
      %cst_20 = arith.constant dense<0.000000e+00> : vector<1x16x16xf32>
      %32 = tpu.matmul %31, %28, %cst_20 {dimension_numbers = #tpu.dot_dimension_numbers<[2], [2], [1], [1], [0, 0, 0, 1, 1, 1], [0], [0]>} : vector<1x16x8xbf16>, vector<1x16x8xbf16>, vector<1x16x16xf32> -> vector<1x16x16xf32>
      "tpu.trace_stop"() : () -> ()
      %c0_21 = arith.constant 0 : index
      %c0_22 = arith.constant 0 : index
      %c0_23 = arith.constant 0 : index
      %33 = vector.load %arg10[%c0_21, %c0_22, %c0_23] : memref<1x16x1xf32, #tpu.memory_space<vmem>>, vector<1x16x1xf32>
      %cst_24 = arith.constant dense<0xFF800000> : vector<1x16xf32>
      %34 = vector.multi_reduction <maximumf>, %32, %cst_24 [2] : vector<1x16x16xf32> to vector<1x16xf32>
      %35 = vector.shape_cast %34 : vector<1x16xf32> to vector<1x16x1xf32>
      %36 = arith.maximumf %33, %35 : vector<1x16x1xf32>
      %37 = arith.subf %33, %36 : vector<1x16x1xf32>
      %38 = math.exp %37 : vector<1x16x1xf32>
      %39 = vector.broadcast %36 : vector<1x16x1xf32> to vector<1x16x16xf32>
      %40 = arith.subf %32, %39 : vector<1x16x16xf32>
      %41 = arith.truncf %40 : vector<1x16x16xf32> to vector<1x16x16xbf16>
      %42 = math.exp %41 : vector<1x16x16xbf16>
      %c0_25 = arith.constant 0 : index
      %c0_26 = arith.constant 0 : index
      %c0_27 = arith.constant 0 : index
      %43 = vector.load %arg11[%c0_25, %c0_26, %c0_27] : memref<1x16x1xf32, #tpu.memory_space<vmem>>, vector<1x16x1xf32>
      %44 = arith.mulf %38, %43 : vector<1x16x1xf32>
      %45 = arith.extf %42 : vector<1x16x16xbf16> to vector<1x16x16xf32>
      %cst_28 = arith.constant dense<0.000000e+00> : vector<1x16xf32>
      %46 = vector.multi_reduction <add>, %45, %cst_28 [2] : vector<1x16x16xf32> to vector<1x16xf32>
      %47 = vector.shape_cast %46 : vector<1x16xf32> to vector<1x16x1xf32>
      %48 = arith.addf %44, %47 : vector<1x16x1xf32>
      %c0_29 = arith.constant 0 : index
      %c0_30 = arith.constant 0 : index
      %c0_31 = arith.constant 0 : index
      %49 = vector.load %arg11[%c0_29, %c0_30, %c0_31] : memref<1x16x1xf32, #tpu.memory_space<vmem>>, vector<1x16x1xf32>
      tpu.vector_store %arg11[%c0_29, %c0_30, %c0_31], %48 {strides = array<i32>} : memref<1x16x1xf32, #tpu.memory_space<vmem>>, vector<1x16x1xf32>,
      %c0_32 = arith.constant 0 : index
      %c0_33 = arith.constant 0 : index
      %c0_34 = arith.constant 0 : index
      %50 = vector.load %arg12[%c0_32, %c0_33, %c0_34] : memref<1x16x8xf32, #tpu.memory_space<vmem>>, vector<1x16x8xf32>
      %51 = vector.broadcast %38 : vector<1x16x1xf32> to vector<1x16x8xf32>
      %52 = arith.mulf %51, %50 : vector<1x16x8xf32>
      "tpu.trace_start"() <{level = 10 : i32, message = "bqk,bkh->bqh"}> : () -> ()
      %cst_35 = arith.constant dense<0.000000e+00> : vector<1x16x8xf32>
      %53 = tpu.matmul %42, %30, %cst_35 {dimension_numbers = #tpu.dot_dimension_numbers<[2], [1], [1], [2], [0, 0, 0, 1, 1, 2], [0], [0]>} : vector<1x16x16xbf16>, vector<1x16x8xbf16>, vector<1x16x8xf32> -> vector<1x16x8xf32>
      "tpu.trace_stop"() : () -> ()
      %54 = arith.addf %52, %53 : vector<1x16x8xf32>
      %c0_36 = arith.constant 0 : index
      %c0_37 = arith.constant 0 : index
      %c0_38 = arith.constant 0 : index
      %55 = vector.load %arg12[%c0_36, %c0_37, %c0_38] : memref<1x16x8xf32, #tpu.memory_space<vmem>>, vector<1x16x8xf32>
      tpu.vector_store %arg12[%c0_36, %c0_37, %c0_38], %54 {strides = array<i32>} : memref<1x16x8xf32, #tpu.memory_space<vmem>>, vector<1x16x8xf32>,
      %c0_39 = arith.constant 0 : index
      %c0_40 = arith.constant 0 : index
      %c0_41 = arith.constant 0 : index
      %56 = vector.load %arg10[%c0_39, %c0_40, %c0_41] : memref<1x16x1xf32, #tpu.memory_space<vmem>>, vector<1x16x1xf32>
      tpu.vector_store %arg10[%c0_39, %c0_40, %c0_41], %36 {strides = array<i32>} : memref<1x16x1xf32, #tpu.memory_space<vmem>>, vector<1x16x1xf32>,
    } else {
    }
    %16 = arith.extui %13 : i1 to i32
    %c0_i32_7 = arith.constant 0 : i32
    %17 = arith.cmpi ne, %16, %c0_i32_7 : i32
    scf.if %17 {
      %c0 = arith.constant 0 : index
      %c0_10 = arith.constant 0 : index
      %c0_11 = arith.constant 0 : index
      %21 = vector.load %arg4[%c0, %c0_10, %c0_11] : memref<1x16x64xbf16, #tpu.memory_space<vmem>>, vector<1x16x64xbf16>
      %22 = vector.shape_cast %21 : vector<1x16x64xbf16> to vector<16x64xbf16>
      %c0_12 = arith.constant 0 : index
      %c0_13 = arith.constant 0 : index
      %23 = vector.load %arg6[%c0_12, %c0_13] : memref<64x8xbf16, #tpu.memory_space<vmem>>, vector<64x8xbf16>
      %cst = arith.constant dense<0.000000e+00> : vector<16x8xf32>
      %24 = tpu.matmul %22, %23, %cst {dimension_numbers = #tpu.dot_dimension_numbers<[1], [0], [0], [1], [0, 0, 1, 1], [], []>} : vector<16x64xbf16>, vector<64x8xbf16>, vector<16x8xf32> -> vector<16x8xf32>
      %c0_14 = arith.constant 0 : index
      %c0_15 = arith.constant 0 : index
      %25 = vector.load %arg7[%c0_14, %c0_15] : memref<64x8xbf16, #tpu.memory_space<vmem>>, vector<64x8xbf16>
      %cst_16 = arith.constant dense<0.000000e+00> : vector<16x8xf32>
      %26 = tpu.matmul %22, %25, %cst_16 {dimension_numbers = #tpu.dot_dimension_numbers<[1], [0], [0], [1], [0, 0, 1, 1], [], []>} : vector<16x64xbf16>, vector<64x8xbf16>, vector<16x8xf32> -> vector<16x8xf32>
      %27 = vector.shape_cast %24 : vector<16x8xf32> to vector<1x16x8xf32>
      %28 = arith.truncf %27 : vector<1x16x8xf32> to vector<1x16x8xbf16>
      %29 = vector.shape_cast %26 : vector<16x8xf32> to vector<1x16x8xf32>
      %30 = arith.truncf %29 : vector<1x16x8xf32> to vector<1x16x8xbf16>
      %c0_17 = arith.constant 0 : index
      %c0_18 = arith.constant 0 : index
      %c0_19 = arith.constant 0 : index
      %31 = vector.load %arg9[%c0_17, %c0_18, %c0_19] : memref<1x16x8xbf16, #tpu.memory_space<vmem>>, vector<1x16x8xbf16>
      "tpu.trace_start"() <{level = 10 : i32, message = "bqh,bkh->bqk"}> : () -> ()
      %cst_20 = arith.constant dense<0.000000e+00> : vector<1x16x16xf32>
      %32 = tpu.matmul %31, %28, %cst_20 {dimension_numbers = #tpu.dot_dimension_numbers<[2], [2], [1], [1], [0, 0, 0, 1, 1, 1], [0], [0]>} : vector<1x16x8xbf16>, vector<1x16x8xbf16>, vector<1x16x16xf32> -> vector<1x16x16xf32>
      "tpu.trace_stop"() : () -> ()
      %33 = tpu.iota {dimensions = array<i32: 0>} : vector<16x16xi32>
      %34 = vector.broadcast %0 : i32 to vector<16x16xi32>
      %35 = arith.addi %34, %33 : vector<16x16xi32>
      %36 = tpu.iota {dimensions = array<i32: 1>} : vector<16x16xi32>
      %37 = vector.broadcast %1 : i32 to vector<16x16xi32>
      %38 = arith.addi %37, %36 : vector<16x16xi32>
      %39 = arith.cmpi sge, %35, %38 : vector<16x16xi32>
      %40 = vector.shape_cast %39 : vector<16x16xi1> to vector<1x16x16xi1>
      %cst_21 = arith.constant 0xFF800000 : f32
      %41 = vector.broadcast %cst_21 : f32 to vector<1x16x16xf32>
      %42 = arith.select %40, %32, %41 : vector<1x16x16xi1>, vector<1x16x16xf32>
      %c0_22 = arith.constant 0 : index
      %c0_23 = arith.constant 0 : index
      %c0_24 = arith.constant 0 : index
      %43 = vector.load %arg10[%c0_22, %c0_23, %c0_24] : memref<1x16x1xf32, #tpu.memory_space<vmem>>, vector<1x16x1xf32>
      %cst_25 = arith.constant dense<0xFF800000> : vector<1x16xf32>
      %44 = vector.multi_reduction <maximumf>, %42, %cst_25 [2] : vector<1x16x16xf32> to vector<1x16xf32>
      %45 = vector.shape_cast %44 : vector<1x16xf32> to vector<1x16x1xf32>
      %46 = arith.maximumf %43, %45 : vector<1x16x1xf32>
      %47 = arith.subf %43, %46 : vector<1x16x1xf32>
      %48 = math.exp %47 : vector<1x16x1xf32>
      %49 = vector.broadcast %46 : vector<1x16x1xf32> to vector<1x16x16xf32>
      %50 = arith.subf %42, %49 : vector<1x16x16xf32>
      %51 = arith.truncf %50 : vector<1x16x16xf32> to vector<1x16x16xbf16>
      %52 = math.exp %51 : vector<1x16x16xbf16>
      %c0_26 = arith.constant 0 : index
      %c0_27 = arith.constant 0 : index
      %c0_28 = arith.constant 0 : index
      %53 = vector.load %arg11[%c0_26, %c0_27, %c0_28] : memref<1x16x1xf32, #tpu.memory_space<vmem>>, vector<1x16x1xf32>
      %54 = arith.mulf %48, %53 : vector<1x16x1xf32>
      %55 = arith.extf %52 : vector<1x16x16xbf16> to vector<1x16x16xf32>
      %cst_29 = arith.constant dense<0.000000e+00> : vector<1x16xf32>
      %56 = vector.multi_reduction <add>, %55, %cst_29 [2] : vector<1x16x16xf32> to vector<1x16xf32>
      %57 = vector.shape_cast %56 : vector<1x16xf32> to vector<1x16x1xf32>
      %58 = arith.addf %54, %57 : vector<1x16x1xf32>
      %c0_30 = arith.constant 0 : index
      %c0_31 = arith.constant 0 : index
      %c0_32 = arith.constant 0 : index
      %59 = vector.load %arg11[%c0_30, %c0_31, %c0_32] : memref<1x16x1xf32, #tpu.memory_space<vmem>>, vector<1x16x1xf32>
      tpu.vector_store %arg11[%c0_30, %c0_31, %c0_32], %58 {strides = array<i32>} : memref<1x16x1xf32, #tpu.memory_space<vmem>>, vector<1x16x1xf32>,
      %c0_33 = arith.constant 0 : index
      %c0_34 = arith.constant 0 : index
      %c0_35 = arith.constant 0 : index
      %60 = vector.load %arg12[%c0_33, %c0_34, %c0_35] : memref<1x16x8xf32, #tpu.memory_space<vmem>>, vector<1x16x8xf32>
      %61 = vector.broadcast %48 : vector<1x16x1xf32> to vector<1x16x8xf32>
      %62 = arith.mulf %61, %60 : vector<1x16x8xf32>
      "tpu.trace_start"() <{level = 10 : i32, message = "bqk,bkh->bqh"}> : () -> ()
      %cst_36 = arith.constant dense<0.000000e+00> : vector<1x16x8xf32>
      %63 = tpu.matmul %52, %30, %cst_36 {dimension_numbers = #tpu.dot_dimension_numbers<[2], [1], [1], [2], [0, 0, 0, 1, 1, 2], [0], [0]>} : vector<1x16x16xbf16>, vector<1x16x8xbf16>, vector<1x16x8xf32> -> vector<1x16x8xf32>
      "tpu.trace_stop"() : () -> ()
      %64 = arith.addf %62, %63 : vector<1x16x8xf32>
      %c0_37 = arith.constant 0 : index
      %c0_38 = arith.constant 0 : index
      %c0_39 = arith.constant 0 : index
      %65 = vector.load %arg12[%c0_37, %c0_38, %c0_39] : memref<1x16x8xf32, #tpu.memory_space<vmem>>, vector<1x16x8xf32>
      tpu.vector_store %arg12[%c0_37, %c0_38, %c0_39], %64 {strides = array<i32>} : memref<1x16x8xf32, #tpu.memory_space<vmem>>, vector<1x16x8xf32>,
      %c0_40 = arith.constant 0 : index
      %c0_41 = arith.constant 0 : index
      %c0_42 = arith.constant 0 : index
      %66 = vector.load %arg10[%c0_40, %c0_41, %c0_42] : memref<1x16x1xf32, #tpu.memory_space<vmem>>, vector<1x16x1xf32>
      tpu.vector_store %arg10[%c0_40, %c0_41, %c0_42], %46 {strides = array<i32>} : memref<1x16x1xf32, #tpu.memory_space<vmem>>, vector<1x16x1xf32>,
    } else {
    }
    %c0_i32_8 = arith.constant 0 : i32
    %18 = arith.cmpi eq, %arg2, %c0_i32_8 : i32
    %19 = arith.extui %18 : i1 to i32
    %c0_i32_9 = arith.constant 0 : i32
    %20 = arith.cmpi ne, %19, %c0_i32_9 : i32
    scf.if %20 {
      %c0 = arith.constant 0 : index
      %c0_10 = arith.constant 0 : index
      %c0_11 = arith.constant 0 : index
      %21 = vector.load %arg12[%c0, %c0_10, %c0_11] : memref<1x16x8xf32, #tpu.memory_space<vmem>>, vector<1x16x8xf32>
      %c0_12 = arith.constant 0 : index
      %c0_13 = arith.constant 0 : index
      %c0_14 = arith.constant 0 : index
      %22 = vector.load %arg11[%c0_12, %c0_13, %c0_14] : memref<1x16x1xf32, #tpu.memory_space<vmem>>, vector<1x16x1xf32>
      %23 = tpu.reciprocal %22 {approx = true} : vector<1x16x1xf32> -> vector<1x16x1xf32>
      %24 = vector.broadcast %23 : vector<1x16x1xf32> to vector<1x16x8xf32>
      %25 = arith.mulf %21, %24 : vector<1x16x8xf32>
      %c0_15 = arith.constant 0 : index
      %c0_16 = arith.constant 0 : index
      %c0_17 = arith.constant 0 : index
      %26 = vector.load %arg8[%c0_15, %c0_16, %c0_17] : memref<1x16x8xf32, #tpu.memory_space<vmem>>, vector<1x16x8xf32>
      tpu.vector_store %arg8[%c0_15, %c0_16, %c0_17], %25 {strides = array<i32>} : memref<1x16x8xf32, #tpu.memory_space<vmem>>, vector<1x16x8xf32>,
    } else {
    }
    return
  }
  func.func @transform_0(%arg0: i32, %arg1: i32, %arg2: i32) -> (i32, i32, i32) {
    %c0_i32 = arith.constant 0 : i32
    %c0_i32_0 = arith.constant 0 : i32
    return %arg0, %arg1, %c0_i32 : i32, i32, i32
  }
  func.func @transform_1(%arg0: i32, %arg1: i32, %arg2: i32) -> (i32, i32, i32) {
    %c0_i32 = arith.constant 0 : i32
    %c0_i32_0 = arith.constant 0 : i32
    return %arg0, %arg2, %c0_i32 : i32, i32, i32
  }
  func.func @transform_2(%arg0: i32, %arg1: i32, %arg2: i32) -> (i32, i32) {
    %c0_i32 = arith.constant 0 : i32
    %c0_i32_0 = arith.constant 0 : i32
    %c0_i32_1 = arith.constant 0 : i32
    return %c0_i32, %c0_i32_0 : i32, i32
  }
  func.func @transform_3(%arg0: i32, %arg1: i32, %arg2: i32) -> (i32, i32) {
    %c0_i32 = arith.constant 0 : i32
    %c0_i32_0 = arith.constant 0 : i32
    %c0_i32_1 = arith.constant 0 : i32
    return %c0_i32, %c0_i32_0 : i32, i32
  }
  func.func @transform_4(%arg0: i32, %arg1: i32, %arg2: i32) -> (i32, i32) {
    %c0_i32 = arith.constant 0 : i32
    %c0_i32_0 = arith.constant 0 : i32
    %c0_i32_1 = arith.constant 0 : i32
    return %c0_i32, %c0_i32_0 : i32, i32
  }
  func.func @transform_5(%arg0: i32, %arg1: i32, %arg2: i32) -> (i32, i32, i32) {
    %c0_i32 = arith.constant 0 : i32
    %c0_i32_0 = arith.constant 0 : i32
    return %arg0, %arg1, %c0_i32 : i32, i32, i32
  }
}

</mosaic_0001>

<bundles_post_ra>
// kernel: tpu_custom_call.1
= control target key start
LH: loop header
LB: loop body
LE: loop exit
PB: predicated region body
PF: predicated region fallthrough
CT: control target
= control target key end

     0   :  { %s1437_s18 = smov 0   ;;  %s1439_s19 = smov 0   ;;  %s1566_s0 = inlined_call_operand.vmem [shape: bf16[2,16,64], index: 0, kind: input, shape index: {}]   ;;  %s1567_s1 = inlined_call_operand.vmem [shape: bf16[2,16,64], index: 1, kind: input, shape index: {}]   ;;  %s1568_s2 = inlined_call_operand.vmem [shape: bf16[64,8], index: 2, kind: input, shape index: {}]   ;;  %s1569_s3 = inlined_call_operand.vmem [shape: bf16[64,8], index: 3, kind: input, shape index: {}]   ;;  %s1570_s4 = inlined_call_operand.vmem [shape: bf16[64,8], index: 4, kind: input, shape index: {}]   ;;  %s1571_s5 = inlined_call_operand.vmem [shape: f32[2,16,8], index: 5, kind: output, shape index: {}]  }
   0x1   :  { %s1441_s20 = smov 0  }
   0x2 LB: > { %s34_s21 = sadd.s32 1, %s1397_s19  ;;  %p1214_p0 = scmp.ge.s32.totalorder %s1401_s20, 1  ;;  %s1401_s20 = sphi %s1441_s20, %s15_s20   ;;  %s1397_s19 = sphi %s1439_s19, %s1573_s19   ;;  %s1393_s18 = sphi %s1437_s18, %s1572_s18  }
   0x3   : > { %p36_p1 = scmp.ge.s32.totalorder %s34_s21, 2  ;;  %p232_p2 = scmp.lt.s32.totalorder %s1401_s20, 3 }
   0x5   : > { %s1575_s21 = smov (%p36_p1, %s34_s21), 0  ;;  %p233_p3 = pnand %p1214_p0, %p232_p2 }
   0x6   : > { %v1355_v0 = vld [vmem:[%s1568_s2] sm:$0xff] (!%p233_p3)   ;;  %v1403_v1 = vmov (!%p233_p3), 0.0   ;;  %v1357_v3 = vld [vmem:[%s1568_s2 + $0x8] sm:$0xff] (!%p233_p3)   ;;  %vm1404_vm0 = vmmov (!%p233_p3), 0   ;;  %p278_p4 = scmp.lt.s32.totalorder (!%p233_p3), %s1393_s18, 1  ;;  %v1359_v5 = vld [vmem:[%s1568_s2 + $0x10] sm:$0xff] (!%p233_p3)   ;;  %v950_v28 = vlaneseq (!%p233_p3) }
   0x7   : > { %236 = sbr.rel (%p233_p3) target bundleno = 1057 (0x421), region = 40  ;;  %1277 = vmatprep.subr.bf16.mxu0 (!%p233_p3), %v1403_v1  ;;  %1289 = vmatprep.subr.bf16.mxu1 (!%p233_p3), %v1403_v1  ;;  %v1356_v2 = vld [vmem:[%s1569_s3] sm:$0xff] (!%p233_p3)   ;;  %v1358_v4 = vld [vmem:[%s1569_s3 + $0x8] sm:$0xff] (!%p233_p3)   ;;  %v1360_v6 = vld [vmem:[%s1569_s3 + $0x10] sm:$0xff] (!%p233_p3)   ;;  %vm353_vm1 = vcmask (!%p233_p3), 523264   ;;  %vm399_vm2 = vcmask (!%p233_p3), 64512  }
   0x8   : > { %1278 = vmatpush3.bf16.msra.mxu0 (!%p233_p3), %v1355_v0  ;;  %1285 = vmatprep.mubr.msk.bf16.mxu0 (!%p233_p3), %vm1404_vm0, %v1403_v1  ;;  %v1361_v7 = vld [vmem:[%s1568_s2 + $0x18] sm:$0xff] (!%p233_p3)   ;;  %406 = vst.msk [vmem:[#allocation5] sm:$0xff] (!%p233_p3), %vm399_vm2, %v1403_v1  ;;  %407 = vst.msk [vmem:[#allocation5 + $0x8] sm:$0xff] (!%p233_p3), %vm399_vm2, %v1403_v1  ;;  %v1365_v23 = vld [vmem:[%s1570_s4] sm:$0xff] (!%p233_p3)   ;;  %vm401_vm3 = vcmask (!%p233_p3), 7168   ;;  %v1405_v24 = vmov (!%p233_p3), -inf  }
   0x9   : > { %1290 = vmatpush3.bf16.msra.mxu1 (!%p233_p3), %v1356_v2  ;;  %1279 = vmatprep.subr.bf16.mxu0 (!%p233_p3), %v1403_v1  ;;  %v1362_v8 = vld [vmem:[%s1569_s3 + $0x18] sm:$0xff] (!%p233_p3)   ;;  %402 = vst.msk [vmem:[#allocation3] sm:$0xff] (!%p233_p3), %vm401_vm3, %v1405_v24  ;;  %403 = vst.msk [vmem:[#allocation3 + $0x8] sm:$0xff] (!%p233_p3), %vm401_vm3, %v1405_v24  ;;  %v1366_v25 = vld [vmem:[%s1570_s4 + $0x8] sm:$0xff] (!%p233_p3)   ;;  %v951_v29 = vshrl.u32 (!%p233_p3), %v950_v28, 7  ;;  %v957_v30 = vand.u32 (!%p233_p3), 127, %v950_v28 }
   0xa   : > { %1291 = vmatprep.subr.bf16.mxu1 (!%p233_p3), %v1403_v1  ;;  %1297 = vmatprep.mubr.msk.bf16.mxu1 (!%p233_p3), %vm1404_vm0, %v1403_v1  ;;  %404 = vst.msk [vmem:[#allocation4] sm:$0xff] (!%p233_p3), %vm401_vm3, %v1403_v1  ;;  %405 = vst.msk [vmem:[#allocation4 + $0x8] sm:$0xff] (!%p233_p3), %vm401_vm3, %v1403_v1  ;;  %v1367_v26 = vld [vmem:[%s1570_s4 + $0x10] sm:$0xff] (!%p233_p3)   ;;  %v1368_v27 = vld [vmem:[%s1570_s4 + $0x18] sm:$0xff] (!%p233_p3)   ;;  %vm966_vm5 = vcmask (!%p233_p3), 130048   ;;  %v1406_v40 = vmov (!%p233_p3), 0  }
   0xb   : > { %v952_v31 = vadd.s32 (!%p233_p3), 8, %v951_v29  ;;  %vm960_vm4 = vcmp.ge.s32.totalorder (!%p233_p3), %v951_v29, %v957_v30  ;;  %1353 = vset.pattern.permute.xlu1 (!%p233_p3), %v1406_v40  ;;  %1354 = vset.pattern.permute.xlu0 (!%p233_p3), %v1406_v40 }
   0xc   : > { %1280 = vmatpush3.bf16.msra.mxu0 (!%p233_p3), %v1357_v3 }
   0xd   : > { %1292 = vmatpush3.bf16.msra.mxu1 (!%p233_p3), %v1358_v4  ;;  %1281 = vmatprep.subr.bf16.mxu0 (!%p233_p3), %v1403_v1  ;;  %vm961_vm6 = vcmp.ge.s32.totalorder (!%p233_p3), %v952_v31, %v957_v30 }
   0xe   : > { %s1577_s18 = smov (!%p278_p4, %s1393_s18), 1  ;;  %1293 = vmatprep.subr.bf16.mxu1 %v1403_v1 }
   0xf   : > { %s1255_s7 = sshll.u32 %s1577_s18, 3 }
  0x10   : > { %s285_s12 = scalar_lea.vmem %s1566_s0, %s1255_s7  ;;  %s295_s17 = scalar_lea.vmem %s1567_s1, %s1255_s7  ;;  %1282 = vmatpush3.bf16.msra.mxu0 %v1359_v5  ;;  %v964_v41 = vld [vmem:[#allocation3] sm:$0xff]  ;;  %v965_v44 = vld [vmem:[#allocation3 + $0x8] sm:$0xff] }
  0x11   : > { %1294 = vmatpush3.bf16.msra.mxu1 %v1360_v6  ;;  %1283 = vmatprep.subr.bf16.mxu0 %v1403_v1  ;;  %v1363_v9 = vld [vmem:[%s285_s12] sm:$0xff]   ;;  %v997_v6 = vld [vmem:[#allocation4] sm:$0xff]  ;;  %s1257_s7 = sshll.u32 %s1577_s18, 4 }
  0x12   : > { %1295 = vmatprep.subr.bf16.mxu1 %v1403_v1  ;;  %v1364_v10 = vld [vmem:[%s295_s17] sm:$0xff]   ;;  %s305_s10 = scalar_lea.vmem %s1571_s5, %s1257_s7 }
  0x13   : > { %v998_v5 = vld [vmem:[#allocation4 + $0x8] sm:$0xff] }
  0x14   : > { %1284 = vmatpush3.bf16.msra.mxu0 %v1361_v7 }
  0x15   : > { %1296 = vmatpush3.bf16.msra.mxu1 %v1362_v8  ;;  %1301 = vmatprep.subr.bf16.mxu0 %v1403_v1 }
  0x16   : > { %1313 = vmatprep.subr.bf16.mxu1 %v1403_v1 }
  0x17   : > { %1286 = vmatmul.mubr.msk.bf16.vlgmr.msra.gmra.mrb[0].mxu0 %vm353_vm1, %v1363_v9 }
  0x18   : > { %1298 = vmatmul.mubr.msk.bf16.vlgmr.msra.gmra.mrb[0].mxu1 %vm353_vm1, %v1364_v10  ;;  %1309 = vmatprep.mubr.msk.bf16.mxu0 %vm1404_vm0, %v1403_v1 }
  0x19   : > { %1315 = vmatprep.mubr.msk.bf16.mxu1 %vm1404_vm0, %v1403_v1  ;;  %1302 = vmatpush3.bf16.msra.mxu0 %v1365_v23 }
  0x1a   : > { %1303 = vmatprep.subr.bf16.mxu0 %v1403_v1 }
  0x1d   : > { %1304 = vmatpush3.bf16.msra.mxu0 %v1366_v25 }
  0x1e   : > { %1305 = vmatprep.subr.bf16.mxu0 %v1403_v1 }
  0x21   : > { %1306 = vmatpush3.bf16.msra.mxu0 %v1367_v26 }
  0x22   : > { %1307 = vmatprep.subr.bf16.mxu0 %v1403_v1 }
  0x25   : > { %1308 = vmatpush3.bf16.msra.mxu0 %v1368_v27 }
  0x28   : > { %1310 = vmatmul.mubr.msk.bf16.vlgmr.msra.gmra.mrb[4].mxu0 %vm353_vm1, %v1364_v10 }
  0xea   : > { %v391_v11 = vpop.f32.mrb[0].mxu0 }
  0xeb   : > { %v819_v12 = vpop.f32.mrb[0].mxu1  ;;  %v1287_v13 = vpop.f32.mrb[1].mxu0 }
  0xec   : > { %v1299_v14 = vpop.f32.mrb[1].mxu1  ;;  %v394_v15 = vpop.f32.mrb[2].mxu0 }
  0xed   : > { %v398_v16 = vpack.c.bf16 %v394_v15, %v391_v11  ;;  %v822_v17 = vpop.f32.mrb[2].mxu1  ;;  %v1288_v18 = vpop.f32.mrb[3].mxu0 }
  0xee   : > { %v899_v19 = vpack.c.bf16 %v822_v17, %v819_v12  ;;  %v1300_v20 = vpop.f32.mrb[3].mxu1  ;;  %v1014_v17 = vld [vmem:[#allocation5] sm:$0xff] }
  0xef   : > { %400 = vst.msk [vmem:[#allocation2] sm:$0xff] %vm399_vm2, %v398_v16 }
  0xf0   : > { %v907_v21 = vsel %vm399_vm2, %v899_v19, 0  ;;  %v1015_v19 = vld [vmem:[#allocation5 + $0x8] sm:$0xff] }
  0xf1   : > { %1314 = vmatpush3.bf16.xpose.msra.mxu1 %v907_v21 }
  0xf2   : > { %1319 = vmatprep.subr.bf16.mxu1 %v1403_v1 }
  0xf6   : > { %v901_v22 = vld [vmem:[#allocation2] sm:$0xff] }
  0xf8   : > { %1316 = vmatmul.mubr.msk.bf16.vlgmr.msra.gmra.mrb[4].mxu1 %vm399_vm2, %v901_v22 }
  0xf9   : > { %1321 = vmatprep.mubr.msk.bf16.mxu1 %vm1404_vm0, %v1403_v1 }
  0xfb   : > { %v892_v49 = vpop.f32.mrb[4].mxu0 }
  0xfc   : > { %v1311_v50 = vpop.f32.mrb[5].mxu0 }
  0xfd   : > { %v895_v51 = vpop.f32.mrb[6].mxu0 }
  0xfe   : > { %v900_v52 = vpack.c.bf16 %v895_v51, %v892_v49  ;;  %v1312_v53 = vpop.f32.mrb[7].mxu0 }
 0x100   : > { %1320 = vmatpush3.bf16.msra.mxu1 %v900_v52 }
 0x1cb   : > { %v943_v32 = vpop.f32.mrb[4].mxu1 }
 0x1cc   : > { %v962_v33 = vsel %vm960_vm4, %v943_v32, -inf  ;;  %v1317_v34 = vpop.f32.mrb[5].mxu1 }
 0x1cd   : > { %v946_v35 = vpop.f32.mrb[6].mxu1  ;;  %v967_v36 = vsel %vm966_vm5, %v962_v33, -inf }
 0x1ce   : > { %v963_v37 = vsel %vm961_vm6, %v946_v35, -inf  ;;  %968 = vmax.xlane.f32.xlu0 %v967_v36  ;;  %v1318_v38 = vpop.f32.mrb[7].mxu1 }
 0x1cf   : > { %v970_v39 = vsel %vm966_vm5, %v963_v37, -inf }
 0x1d2   : > { %971 = vmax.xlane.f32.xlu0 %v970_v39 }
 0x25b   : > { %v969_v42 = vpop.xlane.xlu0 %968 }
 0x25c   : > { %v973_v43 = vmax.f32 %v964_v41, %v969_v42 }
 0x25e   : > { %v975_v45 = vsub.f32 %v964_v41, %v973_v43  ;;  %1076 = vst.msk [vmem:[#allocation3] sm:$0xff] %vm401_vm3, %v973_v43  ;;  %983 = vperm.xlu1 %1353, %v973_v43  }
 0x25f   : > { %v972_v46 = vpop.xlane.xlu0 %971 }
 0x260   : > { %v974_v47 = vmax.f32 %v965_v44, %v972_v46  ;;  %v977_v2 = vmul.f32 1.442695, %v975_v45 }
 0x262   : > { %v976_v48 = vsub.f32 %v965_v44, %v974_v47  ;;  %1077 = vst.msk [vmem:[#allocation3 + $0x8] sm:$0xff] %vm401_vm3, %v974_v47  ;;  %988 = vperm.xlu1 %1353, %v974_v47  }
 0x264   : > { %v979_v1 = vmul.f32 1.442695, %v976_v48 }
 0x2dd   : > { %v984_v54 = vpop.permute.xlu1 %983 }
 0x2de   : > { %v991_v56 = vsub.f32 %v962_v33, %v984_v54 }
 0x2e1   : > { %v989_v55 = vpop.permute.xlu1 %988 }
 0x2e2   : > { %v992_v57 = vsub.f32 %v963_v37, %v989_v55 }
 0x2e4   : > { %v993_v58 = vpack.c.bf16 %v992_v57, %v991_v56 }
 0x2e6   : > { %v995_v59 = vmul.bf16 1069105081, %v993_v58 }
 0x2e8   : > { %1369 = vpow.bf16 %v995_v59 }
 0x2e9   : > { %1371 = vpow2.f32 %v979_v1 }
 0x2ea   : > { %1373 = vpow2.f32 %v977_v2 }
 0x2f3   : > { %v1370_v60 = vpop.eup %1369 }
 0x2f4   : > { %1322 = vmatmul.mubr.msk.bf16.vlgmr.msra.gmra.mrb[8].mxu1 %vm966_vm5, %v1370_v60  ;;  %v1002_v61 = vunpack.c.h.bf16 %v1370_v60  ;;  %v1001_v62 = vunpack.c.l.bf16 %v1370_v60  ;;  %v1372_v3 = vpop.eup %1371 }
 0x2f5   : > { %v1374_v4 = vpop.eup %1373  ;;  %v1000_v7 = vmul.f32 %v1372_v3, %v998_v5 }
 0x2f6   : > { %v1006_v63 = vsel %vm966_vm5, %v1002_v61, 0.0  ;;  %v1003_v0 = vsel %vm966_vm5, %v1001_v62, 0.0  ;;  %v999_v8 = vmul.f32 %v1374_v4, %v997_v6 }
 0x2f7   : > { %1007 = vadd.xlane.f32.xlu1 %v1006_v63  ;;  %1004 = vadd.xlane.f32.xlu0 %v1003_v0 }
 0x308   : > { %1023 = vperm.xlu1 %1353, %v1372_v3  }
 0x30d   : > { %1018 = vperm.xlu0 %1354, %v1374_v4  }
 0x384   : > { %v1008_v9 = vpop.xlane.xlu1 %1007  ;;  %v1005_v10 = vpop.xlane.xlu0 %1004 }
 0x385   : > { %v1010_v11 = vadd.f32 %v1008_v9, %v1000_v7  ;;  %v1009_v12 = vadd.f32 %v1005_v10, %v999_v8 }
 0x387   : > { %1013 = vst.msk [vmem:[#allocation4 + $0x8] sm:$0xff] %vm401_vm3, %v1010_v11  ;;  %1012 = vst.msk [vmem:[#allocation4] sm:$0xff] %vm401_vm3, %v1009_v12 }
 0x388   : > { %v1024_v20 = vpop.permute.xlu1 %1023 }
 0x389   : > { %v1027_v23 = vmul.f32 %v1024_v20, %v1015_v19 }
 0x38c   : > { %v1019_v18 = vpop.permute.xlu0 %1018 }
 0x38d   : > { %v1026_v21 = vmul.f32 %v1019_v18, %v1014_v17 }
 0x38e   : > { %v1083_v13 = vld [vmem:[#allocation4] sm:$0xff]  ;;  %v1084_v14 = vld [vmem:[#allocation4 + $0x8] sm:$0xff] }
 0x38f   : > { %1375 = vrcp.f32 %v1083_v13 }
 0x390   : > { %1377 = vrcp.f32 %v1084_v14 }
 0x399   : > { %v1376_v15 = vpop.eup %1375 }
 0x39a   : > { %1089 = vperm.xlu0 %1354, %v1376_v15   ;;  %v1378_v16 = vpop.eup %1377 }
 0x39e   : > { %1094 = vperm.xlu0 %1354, %v1378_v16  }
 0x3c7   : > { %v1065_v22 = vpop.f32.mrb[8].mxu1 }
 0x3c8   : > { %v1072_v24 = vadd.f32 %v1065_v22, %v1026_v21  ;;  %v1323_v25 = vpop.f32.mrb[9].mxu1 }
 0x3c9   : > { %v1068_v26 = vpop.f32.mrb[10].mxu1 }
 0x3ca   : > { %1074 = vst.msk [vmem:[#allocation5] sm:$0xff] %vm399_vm2, %v1072_v24  ;;  %v1073_v27 = vadd.f32 %v1068_v26, %v1027_v23  ;;  %v1324_v28 = vpop.f32.mrb[11].mxu1 }
 0x3cc   : > { %1075 = vst.msk [vmem:[#allocation5 + $0x8] sm:$0xff] %vm399_vm2, %v1073_v27 }
 0x3d1   : > { %v1081_v30 = vld [vmem:[#allocation5] sm:$0xff] }
 0x3d3   : > { %v1082_v33 = vld [vmem:[#allocation5 + $0x8] sm:$0xff] }
 0x419   : > { %v1090_v29 = vpop.permute.xlu0 %1089 }
 0x41a   : > { %v1097_v31 = vmul.f32 %v1090_v29, %v1081_v30 }
 0x41c   : > { %1100 = vst.msk [vmem:[%s305_s10] sm:$0xff] %vm399_vm2, %v1097_v31 }
 0x41d   : > { %v1095_v32 = vpop.permute.xlu0 %1094 }
 0x41e   : > { %v1098_v34 = vmul.f32 %v1095_v32, %v1082_v33 }
 0x420   : > { %1101 = vst.msk [vmem:[%s305_s10 + $0x8] sm:$0xff] %vm399_vm2, %v1098_v34 }
 0x421 PF: > { %s15_s20 = sadd.s32 1, %s1401_s20   ;;  %s1572_s18 = smov %s1397_s19 }
 0x422   : > { %p12_p5 = scmp.ge.s32.totalorder %s15_s20, 4   ;;  %s1573_s19 = smov %s1575_s21 }
 0x424   :  { %14 = sbr.rel (!%p12_p5) target bundleno = 2 (0x2), region = 89 }

</bundles_post_ra>
